<compile_context>
chip_gen: v7x
topology: tpu7x:2x2x1
jax: 0.10.0
libtpu: 0.0.40
codegen_flags: <defaults>
</compile_context>

<pallas_src>
import functools

import jax
import jax.numpy as jnp
from jax.experimental import pallas as pl
from jax.experimental.pallas import tpu as pltpu


def _round_up(x, m):
    return (x + m - 1) // m * m


def _tpu_info():
    """Best-effort (num_tensorcores, vmem_capacity_bytes) with safe fallbacks."""
    cores, vmem_cap = 1, 128 * 1024 * 1024
    try:
        info = pltpu.get_tpu_info()
        vmem_cap = int(getattr(info, "vmem_capacity_bytes", vmem_cap))
        for attr in ("num_cores", "tensorcore_count", "num_tensorcores",
                     "core_count", "cores_per_chip"):
            v = getattr(info, attr, None)
            if v:
                cores = int(v)
                break
    except Exception:
        pass
    # TPU chips have at most 2 TensorCores per chip; clamp for safety.
    return min(max(1, cores), 2), vmem_cap


def hybrid_embed_kernel(x_ref, wb_ref, bb_ref, wp_ref, bp_ref, o_ref):
    """Fused backbone-conv (as matmul) + bias + ReLU + 1x1-conv projection.

    x_ref : (tm, K1)      bf16 im2col rows (gathered 2x2 patches)
    wb_ref: (K1, F_pad)   bf16 backbone conv weight (zero-padded to 128 lanes)
    bb_ref: (1,  F_pad)   f32  backbone bias
    wp_ref: (F_pad, E)    bf16 1x1 projection weight
    bp_ref: (1,  E)       f32  projection bias
    o_ref : (tm, E)       bf16 output tokens
    """
    # Backbone conv as one MXU matmul, f32 accumulation.
    feat = jnp.dot(x_ref[...], wb_ref[...], preferred_element_type=jnp.float32)
    feat = jnp.maximum(feat + bb_ref[...], 0.0)          # bias + ReLU in f32
    # 1x1 projection conv: second MXU matmul (bf16 operands, f32 accumulation).
    out = jnp.dot(feat.astype(wp_ref.dtype), wp_ref[...],
                  preferred_element_type=jnp.float32)
    o_ref[...] = (out + bp_ref[...]).astype(o_ref.dtype)   # bias in f32, store bf16


def hybrid_embed(x_nchw, w_backbone, b_backbone, w_proj, b_proj, *, stride=2):
    """x_nchw: (B, C, H, W) f32.  Returns (B, num_patches, embed_dim) bf16."""
    B, C, H, W = x_nchw.shape
    F_dim = w_backbone.shape[0]          # (F, C, kh, kw)
    E = w_proj.shape[0]                  # (E, F, 1, 1)
    kh = kw = stride
    Hf, Wf = H // kh, W // kw
    M = B * Hf * Wf
    K1 = C * kh * kw

    # F is internal (weights + VMEM intermediate) -> pad to lane width.
    # E is the HBM output width -> never padded (see header comment).
    F_pad = _round_up(F_dim, 128)

    num_cores, vmem_cap = _tpu_info()
    out_dtype = jnp.bfloat16
    out_bytes = 2

    # --- tile-size selection -------------------------------------------------
    # VMEM budget for per-step blocks: double-buffered token/output tiles plus
    # the f32/bf16 feat intermediates, leaving headroom for weights + scratch.
    bytes_per_row = (2 * 2 * K1            # bf16 token block, double-buffered
                     + 2 * out_bytes * E   # output block, double-buffered
                     + 6 * F_pad           # f32 feat + bf16 feat copy
                     + 4 * E)              # f32 pre-cast projection result
    weight_bytes = 2 * (K1 * F_pad * 2 + F_pad * 4 + F_pad * E * 2 + E * 4)
    BLOCK_BUDGET = 24 * 1024 * 1024        # fits v7x's 64 MiB physical VMEM
    tm_budget = max(8, (BLOCK_BUDGET - weight_bytes) // bytes_per_row // 8 * 8)

    TM_MAX = 2048                          # amortizes ~0.35us/step overhead
    tm_cap = max(8, min(TM_MAX, tm_budget))
    # Program count: only split for multiple TensorCores (v7x); keep it a
    # multiple of the core count so no core idles on a tail step.
    n_prog = max(num_cores, pl.cdiv(M, tm_cap))
    n_prog = _round_up(n_prog, num_cores)
    tm = min(tm_cap, _round_up(pl.cdiv(M, n_prog), 8))
    M_pad = tm * n_prog                    # == M whenever M divides evenly
    grid = (n_prog,)

    # --- glue: gather non-overlapping kh x kw patches (pure layout work).
    # Cast to bf16 FIRST so the im2col pass writes half the bytes; keep x_tok
    # materialized so the kernel's token DMA is a contiguous row-major copy.
    # (B, C, Hf, kh, Wf, kw) -> (B, Hf, Wf, C, kh, kw) -> (M, K1)
    x_tok = (
        x_nchw.astype(jnp.bfloat16)
        .reshape(B, C, Hf, kh, Wf, kw)
        .transpose(0, 2, 4, 1, 3, 5)
        .reshape(M, K1)
    )
    if M_pad != M:
        x_tok = jnp.pad(x_tok, ((0, M_pad - M), (0, 0)))

    # Weights: reshape + transpose; zero-pad only the internal F axis.
    wb = w_backbone.reshape(F_dim, K1).T.astype(jnp.bfloat16)   # (K1, F)
    bb = b_backbone.astype(jnp.float32).reshape(1, F_dim)       # (1, F)
    wp = w_proj.reshape(E, F_dim).T.astype(jnp.bfloat16)        # (F, E)
    bp = b_proj.astype(jnp.float32).reshape(1, E)               # (1, E)
    if F_pad != F_dim:
        wb = jnp.pad(wb, ((0, 0), (0, F_pad - F_dim)))
        bb = jnp.pad(bb, ((0, 0), (0, F_pad - F_dim)))
        wp = jnp.pad(wp, ((0, F_pad - F_dim), (0, 0)))

    flops = 2 * M_pad * (K1 * F_pad + F_pad * E)
    bytes_accessed = (
        M_pad * K1 * 2                       # bf16 token stream
        + (K1 * F_pad + F_pad * E) * 2       # bf16 weights
        + (F_pad + E) * 4                    # f32 biases
        + M_pad * E * out_bytes              # bf16 output
    )

    # ~48 MiB on v7x (64 MiB physical), 96 MiB on v5e/v6e (128 MiB physical).
    vmem_limit = int(max(32 * 1024 * 1024,
                         min(vmem_cap * 3 // 4, 96 * 1024 * 1024)))

    out_tok = pl.pallas_call(
        hybrid_embed_kernel,
        out_shape=jax.ShapeDtypeStruct((M_pad, E), out_dtype),
        grid_spec=pltpu.PrefetchScalarGridSpec(
            num_scalar_prefetch=0,
            grid=grid,
            in_specs=[
                pl.BlockSpec((tm, K1), lambda i: (i, 0)),        # tokens
                pl.BlockSpec((K1, F_pad), lambda i: (0, 0)),     # backbone W
                pl.BlockSpec((1, F_pad), lambda i: (0, 0)),      # backbone b
                pl.BlockSpec((F_pad, E), lambda i: (0, 0)),      # proj W
                pl.BlockSpec((1, E), lambda i: (0, 0)),          # proj b
            ],
            out_specs=pl.BlockSpec((tm, E), lambda i: (i, 0)),
        ),
        compiler_params=pltpu.CompilerParams(
            dimension_semantics=("parallel",),
            vmem_limit_bytes=vmem_limit,
        ),
        cost_estimate=pl.CostEstimate(
            flops=flops, transcendentals=0, bytes_accessed=bytes_accessed),
    )(x_tok, wb, bb, wp, bp)

    # When M_pad == M (common case by construction) this is a free view.
    if M_pad != M:
        out_tok = out_tok[:M]
    # (M, E) -> (B, Hf*Wf, E)  ==  proj(x).flatten(2).transpose(1, 2).
    return out_tok.reshape(B, Hf * Wf, E)


def _reference(x_nchw, w_backbone, b_backbone, w_proj, b_proj, *, stride=2):
    """Plain-JAX f32 reference mirroring the PyTorch forward."""
    feat = jax.lax.conv_general_dilated(
        x_nchw, w_backbone, window_strides=(stride, stride), padding="VALID",
        dimension_numbers=("NCHW", "OIHW", "NCHW"),
    ) + b_backbone[None, :, None, None]
    feat = jnp.maximum(feat, 0.0)
    proj = jax.lax.conv_general_dilated(
        feat, w_proj, window_strides=(1, 1), padding="VALID",
        dimension_numbers=("NCHW", "OIHW", "NCHW"),
    ) + b_proj[None, :, None, None]
    B, E, Hf, Wf = proj.shape
    return proj.reshape(B, E, Hf * Wf).transpose(0, 2, 1)


if __name__ == "__main__":
    # Small shapes consistent with the module's forward (NCHW like PyTorch).
    B, C, H, W = 2, 4, 16, 16
    stride = 2                         # synthetic backbone: 2x2 / stride 2
    feature_dim = 32                   # backbone output channels
    embed_dim = 32                     # projection (embed) dim

    key = jax.random.PRNGKey(0)
    k_x, k_wb, k_bb, k_wp, k_bp = jax.random.split(key, 5)

    x = jax.random.normal(k_x, (B, C, H, W), dtype=jnp.float32)
    w_backbone = jax.random.normal(
        k_wb, (feature_dim, C, stride, stride), dtype=jnp.float32) * 0.1
    b_backbone = jax.random.normal(k_bb, (feature_dim,), dtype=jnp.float32) * 0.1
    w_proj = jax.random.normal(
        k_wp, (embed_dim, feature_dim, 1, 1), dtype=jnp.float32) * 0.1
    b_proj = jax.random.normal(k_bp, (embed_dim,), dtype=jnp.float32) * 0.1

    fwd = jax.jit(functools.partial(hybrid_embed, stride=stride))
    out = fwd(x, w_backbone, b_backbone, w_proj, b_proj)
    out = jax.block_until_ready(out)

    ref = _reference(x, w_backbone, b_backbone, w_proj, b_proj, stride=stride)
    assert out.shape == (B, (H // stride) * (W // stride), embed_dim), out.shape
    assert out.dtype == jnp.bfloat16, out.dtype
    # bf16 MXU operands + bf16 output (f32 accumulation) vs f32 conv reference.
    assert jnp.allclose(out.astype(jnp.float32), ref, atol=5e-2, rtol=5e-2), \
        "mismatch vs reference"

    print("KERNEL_OK")
</pallas_src>

<mosaic_0001>
module attributes {stable_mosaic.version = 11 : i64} {
  func.func @hybrid_embed_kernel(%arg0: i32, %arg1: memref<128x16xbf16, #tpu.memory_space<vmem>>, %arg2: memref<16x128xbf16, #tpu.memory_space<vmem>>, %arg3: memref<1x128xf32, #tpu.memory_space<vmem>>, %arg4: memref<128x32xbf16, #tpu.memory_space<vmem>>, %arg5: memref<1x32xf32, #tpu.memory_space<vmem>>, %arg6: memref<128x32xbf16, #tpu.memory_space<vmem>>) attributes {dimension_semantics = [#tpu.dimension_semantics<parallel>], iteration_bounds = array<i64: 1>, scalar_prefetch = 0 : i64, scratch_operands = 0 : i64, tpu.core_type = #tpu.core_type<tc>, window_params = [{transform_indices = @transform_0, window_bounds = array<i64: 128, 16>}, {pipeline_mode = #tpu.pipeline_mode<synchronous>, transform_indices = @transform_1, window_bounds = array<i64: 16, 128>}, {pipeline_mode = #tpu.pipeline_mode<synchronous>, transform_indices = @transform_2, window_bounds = array<i64: 1, 128>}, {pipeline_mode = #tpu.pipeline_mode<synchronous>, transform_indices = @transform_3, window_bounds = array<i64: 128, 32>}, {pipeline_mode = #tpu.pipeline_mode<synchronous>, transform_indices = @transform_4, window_bounds = array<i64: 1, 32>}, {transform_indices = @transform_5, window_bounds = array<i64: 128, 32>}]} {
    %c0 = arith.constant 0 : index
    %c0_0 = arith.constant 0 : index
    %0 = vector.load %arg1[%c0, %c0_0] : memref<128x16xbf16, #tpu.memory_space<vmem>>, vector<128x16xbf16>
    %c0_1 = arith.constant 0 : index
    %c0_2 = arith.constant 0 : index
    %1 = vector.load %arg2[%c0_1, %c0_2] : memref<16x128xbf16, #tpu.memory_space<vmem>>, vector<16x128xbf16>
    %cst = arith.constant dense<0.000000e+00> : vector<128x128xf32>
    %2 = tpu.matmul %0, %1, %cst {dimension_numbers = #tpu.dot_dimension_numbers<[1], [0], [0], [1], [0, 0, 1, 1], [], []>} : vector<128x16xbf16>, vector<16x128xbf16>, vector<128x128xf32> -> vector<128x128xf32>
    %c0_3 = arith.constant 0 : index
    %c0_4 = arith.constant 0 : index
    %3 = vector.load %arg3[%c0_3, %c0_4] : memref<1x128xf32, #tpu.memory_space<vmem>>, vector<1x128xf32>
    %4 = vector.broadcast %3 : vector<1x128xf32> to vector<128x128xf32>
    %5 = arith.addf %2, %4 : vector<128x128xf32>
    %cst_5 = arith.constant 0.000000e+00 : f32
    %6 = vector.broadcast %cst_5 : f32 to vector<128x128xf32>
    %7 = arith.maximumf %5, %6 : vector<128x128xf32>
    %8 = arith.truncf %7 : vector<128x128xf32> to vector<128x128xbf16>
    %c0_6 = arith.constant 0 : index
    %c0_7 = arith.constant 0 : index
    %9 = vector.load %arg4[%c0_6, %c0_7] : memref<128x32xbf16, #tpu.memory_space<vmem>>, vector<128x32xbf16>
    %cst_8 = arith.constant dense<0.000000e+00> : vector<128x32xf32>
    %10 = tpu.matmul %8, %9, %cst_8 {dimension_numbers = #tpu.dot_dimension_numbers<[1], [0], [0], [1], [0, 0, 1, 1], [], []>} : vector<128x128xbf16>, vector<128x32xbf16>, vector<128x32xf32> -> vector<128x32xf32>
    %c0_9 = arith.constant 0 : index
    %c0_10 = arith.constant 0 : index
    %11 = vector.load %arg5[%c0_9, %c0_10] : memref<1x32xf32, #tpu.memory_space<vmem>>, vector<1x32xf32>
    %12 = vector.broadcast %11 : vector<1x32xf32> to vector<128x32xf32>
    %13 = arith.addf %10, %12 : vector<128x32xf32>
    %14 = arith.truncf %13 : vector<128x32xf32> to vector<128x32xbf16>
    %c0_11 = arith.constant 0 : index
    %c0_12 = arith.constant 0 : index
    %15 = vector.load %arg6[%c0_11, %c0_12] : memref<128x32xbf16, #tpu.memory_space<vmem>>, vector<128x32xbf16>
    tpu.vector_store %arg6[%c0_11, %c0_12], %14 {strides = array<i32>} : memref<128x32xbf16, #tpu.memory_space<vmem>>, vector<128x32xbf16>,
    return
  }
  func.func @transform_0(%arg0: i32) -> (i32, i32) {
    %c0_i32 = arith.constant 0 : i32
    %c0_i32_0 = arith.constant 0 : i32
    return %arg0, %c0_i32 : i32, i32
  }
  func.func @transform_1(%arg0: i32) -> (i32, i32) {
    %c0_i32 = arith.constant 0 : i32
    %c0_i32_0 = arith.constant 0 : i32
    %c0_i32_1 = arith.constant 0 : i32
    return %c0_i32, %c0_i32_0 : i32, i32
  }
  func.func @transform_2(%arg0: i32) -> (i32, i32) {
    %c0_i32 = arith.constant 0 : i32
    %c0_i32_0 = arith.constant 0 : i32
    %c0_i32_1 = arith.constant 0 : i32
    return %c0_i32, %c0_i32_0 : i32, i32
  }
  func.func @transform_3(%arg0: i32) -> (i32, i32) {
    %c0_i32 = arith.constant 0 : i32
    %c0_i32_0 = arith.constant 0 : i32
    %c0_i32_1 = arith.constant 0 : i32
    return %c0_i32, %c0_i32_0 : i32, i32
  }
  func.func @transform_4(%arg0: i32) -> (i32, i32) {
    %c0_i32 = arith.constant 0 : i32
    %c0_i32_0 = arith.constant 0 : i32
    %c0_i32_1 = arith.constant 0 : i32
    return %c0_i32, %c0_i32_0 : i32, i32
  }
  func.func @transform_5(%arg0: i32) -> (i32, i32) {
    %c0_i32 = arith.constant 0 : i32
    %c0_i32_0 = arith.constant 0 : i32
    return %arg0, %c0_i32 : i32, i32
  }
}

</mosaic_0001>

<bundles_post_ra>
// kernel: hybrid_embed.1
= control target key start
LH: loop header
LB: loop body
LE: loop exit
PB: predicated region body
PF: predicated region fallthrough
CT: control target
= control target key end

     0   :  { %10 = vsyncpa [#allocation3], 0  ;;  %s1039_s0 = inlined_call_operand.hbm [shape: bf16[128,16], index: 0, kind: input, shape index: {}]   ;;  %s1040_s1 = inlined_call_operand.hbm [shape: bf16[16,128], index: 1, kind: input, shape index: {}]   ;;  %s1041_s2 = inlined_call_operand.hbm [shape: f32[1,128], index: 2, kind: input, shape index: {}]   ;;  %s1042_s3 = inlined_call_operand.hbm [shape: bf16[128,32], index: 3, kind: input, shape index: {}]   ;;  %s1043_s4 = inlined_call_operand.hbm [shape: f32[1,32], index: 4, kind: input, shape index: {}]   ;;  %s1044_s5 = inlined_call_operand.hbm [shape: bf16[128,32], index: 5, kind: output, shape index: {}]  }
   0x1   :  { %11 = vsyncpa [#allocation6], 0 }
   0x2   :  { %12 = vsyncpa [#allocation9], 0 }
   0x3   :  { %13 = vsyncpa [#allocation4], 0  ;;  %s886_s18 = smov [#allocation5]   ;;  %s887_s20 = smov [#allocation8]  }
   0x4   :  { %s31_s19 = sshll.u32 %s886_s18, 4  ;;  %s53_s21 = sshll.u32 %s887_s20, 4  ;;  %s32_s19 = int_to_ptr.vmem [resolvable:$true] %s31_s19  ;;  %s924_s21 = int_to_ptr.vmem [resolvable:$true] %s53_s21 }
   0x5   :  { %s746_s24 = scalar_lea.hbm %s1040_s1, 128 }
   0x6   :  { %p747_p0 = scmp.ne.s32.totalorder %s1040_s1, %s746_s24  ;;  %p750_p1 = scmp.lt.u32.totalorder %s746_s24, %s1040_s1 }
   0x8   :  { %p752_p2 = pnand %p750_p1, %p747_p0 }
   0xa   :  { %755 = shalt.err (!%p752_p2)
}
   0xb   :  { %s756_s29 = scalar_lea.vmem %s32_s19, 128  ;;  %p761_p4 = scmp.lt.s32.totalorder %s32_s19, %s32_s19 }
   0xc   :  { %p757_p3 = scmp.ne.s32.totalorder %s32_s19, %s756_s29  ;;  %p762_p5 = scmp.lt.s32.totalorder %s756_s29, %s756_s29 }
   0xe   :  { %p763_p6 = por %p762_p5, %p761_p4 }
  0x10   :  { %p764_p7 = pnand %p763_p6, %p757_p3 }
  0x12   :  { %767 = shalt.err (!%p764_p7)
}
  0x13   :  { %s888_s30 = smov 64   ;;  %s889_s6 = smov 4  }
  0x14   :  { %37 = dma.hbm_to_vmem [thread:$0]  %s1040_s1, 128, %s32_s19, [#allocation6], %s888_s30, %s888_s30, %s889_s6  }
  0x15   :  { %s768_s11 = scalar_lea.hbm %s1042_s3, 1024 }
  0x16   :  { %p769_p8 = scmp.ne.s32.totalorder %s1042_s3, %s768_s11  ;;  %p772_p9 = scmp.lt.u32.totalorder %s768_s11, %s1042_s3 }
  0x18   :  { %p774_p10 = pnand %p772_p9, %p769_p8 }
  0x1a   :  { %777 = shalt.err (!%p774_p10)
}
  0x1b   :  { %s778_s16 = scalar_lea.vmem %s924_s21, 1024  ;;  %p783_p12 = scmp.lt.s32.totalorder %s924_s21, %s924_s21 }
  0x1c   :  { %p779_p11 = scmp.ne.s32.totalorder %s924_s21, %s778_s16  ;;  %p784_p13 = scmp.lt.s32.totalorder %s778_s16, %s778_s16 }
  0x1e   :  { %p785_p0 = por %p784_p13, %p783_p12 }
  0x20   :  { %p786_p1 = pnand %p785_p0, %p779_p11 }
  0x22   :  { %789 = shalt.err (!%p786_p1)
}
  0x23   :  { %59 = dma.hbm_to_vmem [thread:$0]  %s1042_s3, 1024, %s924_s21, [#allocation9], %s888_s30, %s888_s30, %s889_s6  }
  0x24   :  { %s890_s18 = smov [#allocation2]   ;;  %s891_s20 = smov [#allocation7]  }
  0x25   :  { %s19_s19 = sshll.u32 %s890_s18, 4  ;;  %s44_s22 = sshll.u32 %s891_s20, 4  ;;  %s20_s19 = int_to_ptr.vmem [resolvable:$true] %s19_s19  ;;  %s45_s22 = int_to_ptr.vmem [resolvable:$true] %s44_s22 }
  0x26   :  { %s790_s25 = scalar_lea.hbm %s1039_s0, 1024 }
  0x27   :  { %p791_p2 = scmp.ne.s32.totalorder %s1039_s0, %s790_s25  ;;  %p794_p3 = scmp.lt.u32.totalorder %s790_s25, %s1039_s0 }
  0x29   :  { %p796_p4 = pnand %p794_p3, %p791_p2 }
  0x2b   :  { %799 = shalt.err (!%p796_p4)
}
  0x2c   :  { %s800_s3 = scalar_lea.vmem %s20_s19, 1024  ;;  %p805_p6 = scmp.lt.s32.totalorder %s20_s19, %s20_s19 }
  0x2d   :  { %p801_p5 = scmp.ne.s32.totalorder %s20_s19, %s800_s3  ;;  %p806_p7 = scmp.lt.s32.totalorder %s800_s3, %s800_s3 }
  0x2f   :  { %p807_p8 = por %p806_p7, %p805_p6 }
  0x31   :  { %p808_p9 = pnand %p807_p8, %p801_p5 }
  0x33   :  { %811 = shalt.err (!%p808_p9)
}
  0x34   :  { %25 = dma.hbm_to_vmem [thread:$0]  %s1039_s0, 1024, %s20_s19, [#allocation3], %s888_s30, %s888_s30, %s889_s6  }
  0x35   :  { %s812_s10 = scalar_lea.hbm %s1041_s2, 16 }
  0x36   :  { %p813_p10 = scmp.ne.s32.totalorder %s1041_s2, %s812_s10  ;;  %p816_p11 = scmp.lt.u32.totalorder %s812_s10, %s1041_s2 }
  0x38   :  { %p818_p12 = pnand %p816_p11, %p813_p10 }
  0x3a   :  { %821 = shalt.err (!%p818_p12)
}
  0x3b   :  { %s822_s15 = scalar_lea.vmem %s45_s22, 16  ;;  %s826_s16 = scalar_lea.vmem %s45_s22, 32 }
  0x3c   :  { %p823_p13 = scmp.ne.s32.totalorder %s45_s22, %s822_s15  ;;  %p827_p0 = scmp.lt.s32.totalorder %s45_s22, %s45_s22 }
  0x3d   :  { %p828_p1 = scmp.lt.s32.totalorder %s826_s16, %s822_s15 }
  0x3f   :  { %p829_p2 = por %p828_p1, %p827_p0 }
  0x41   :  { %p830_p3 = pnand %p829_p2, %p823_p13 }
  0x43   :  { %833 = shalt.err (!%p830_p3)
}
  0x44   :  { %47 = dma.hbm_to_vmem [thread:$0]  %s1041_s2, 16, %s45_s22, [#allocation6]  }
  0x45   :  { %s892_s17 = smov [#allocation10]   ;;  %s834_s23 = scalar_lea.hbm %s1043_s4, 16 }
  0x46   :  { %s66_s18 = sshll.u32 %s892_s17, 4  ;;  %p835_p4 = scmp.ne.s32.totalorder %s1043_s4, %s834_s23  ;;  %s67_s18 = int_to_ptr.vmem [resolvable:$true] %s66_s18 }
  0x47   :  { %p838_p5 = scmp.lt.u32.totalorder %s834_s23, %s1043_s4 }
  0x49   :  { %p840_p6 = pnand %p838_p5, %p835_p4 }
  0x4b   :  { %843 = shalt.err (!%p840_p6)
}
  0x4c   :  { %s844_s28 = scalar_lea.vmem %s67_s18, 16  ;;  %s848_s2 = scalar_lea.vmem %s67_s18, 32 }
  0x4d   :  { %p845_p7 = scmp.ne.s32.totalorder %s67_s18, %s844_s28  ;;  %p849_p8 = scmp.lt.s32.totalorder %s67_s18, %s67_s18 }
  0x4e   :  { %p850_p9 = scmp.lt.s32.totalorder %s848_s2, %s844_s28 }
  0x50   :  { %p851_p10 = por %p850_p9, %p849_p8 }
  0x52   :  { %p852_p11 = pnand %p851_p10, %p845_p7 }
  0x54   :  { %855 = shalt.err (!%p852_p11)
}
  0x55   :  { %69 = dma.hbm_to_vmem [thread:$0]  %s1043_s4, 16, %s67_s18, [#allocation9]  }
  0x56   :  { %878 = dma.done.wait [#allocation3], 1024  }
  0x57   :  { %879 = vsyncadd [#allocation3], 4294966272 }
  0x58   :  { %880 = dma.done.wait [#allocation6], 144  }
  0x59   :  { %881 = vsyncadd [#allocation6], 4294967152 }
  0x5a   :  { %882 = dma.done.wait [#allocation9], 1040  }
  0x5b   :  { %883 = vsyncadd [#allocation9], 4294966256  ;;  %v729_v0 = vld [vmem:[#allocation5] sm:$0xff]   ;;  %vm157_vm0 = vcmask 130048   ;;  %v731_v2 = vld [vmem:[#allocation2 + $0x8] sm:$0xff]   ;;  %vm535_vm1 = vcmask 257024  }
  0x5c   :  { %v730_v1 = vld [vmem:[#allocation2] sm:$0xff]   ;;  %655 = vmatprep.subr.bf16.mxu0 %v729_v0  ;;  %v732_v3 = vld [vmem:[#allocation2 + $0x10] sm:$0xff]   ;;  %v733_v4 = vld [vmem:[#allocation2 + $0x18] sm:$0xff]   ;;  %s893_s4 = smov [#allocation11]  }
  0x5d   :  { %656 = vmatpush3.bf16.msra.mxu0 %v729_v0  ;;  %657 = vmatprep.mubr.msk.bf16.mxu0 %vm157_vm0, %v730_v1  ;;  %v738_v5 = vld [vmem:[#allocation8] sm:$0xff]   ;;  %v739_v6 = vld [vmem:[#allocation8 + $0x8] sm:$0xff]   ;;  %v734_v7 = vld [vmem:[#allocation2 + $0x20] sm:$0xff]   ;;  %s557_s3 = sshll.u32 %s893_s4, 4  ;;  %s558_s3 = int_to_ptr.vmem [resolvable:$true] %s557_s3 }
  0x5e   :  { %673 = vmatprep.subr.bf16.mxu0 %v738_v5  ;;  %705 = vmatprep.subr.bf16.mxu1 %v738_v5  ;;  %v740_v8 = vld [vmem:[#allocation8 + $0x10] sm:$0xff]   ;;  %v741_v9 = vld [vmem:[#allocation8 + $0x18] sm:$0xff]   ;;  %v736_v11 = vld [vmem:[#allocation2 + $0x30] sm:$0xff]   ;;  %s856_s21 = scalar_lea.vmem %s558_s3, 1024  ;;  %p861_p13 = scmp.lt.s32.totalorder %s558_s3, %s558_s3 }
  0x5f   :  { %713 = vmatpush3.bf16.msra.mxu1 %v738_v5  ;;  %v735_v10 = vld [vmem:[#allocation2 + $0x28] sm:$0xff]   ;;  %v743_v13 = vld [vmem:[#allocation8 + $0x28] sm:$0xff]   ;;  %v744_v15 = vld [vmem:[#allocation8 + $0x30] sm:$0xff]   ;;  %p857_p12 = scmp.ne.s32.totalorder %s558_s3, %s856_s21  ;;  %p862_p0 = scmp.lt.s32.totalorder %s856_s21, %s856_s21 }
  0x60   :  { %658 = vmatmul.mubr.msk.bf16.vlgmr.msra.gmra.mrb[0].mxu0 %vm157_vm0, %v731_v2  ;;  %706 = vmatprep.subr.bf16.mxu1 %v739_v6  ;;  %v742_v12 = vld [vmem:[#allocation8 + $0x20] sm:$0xff]   ;;  %v737_v14 = vld [vmem:[#allocation2 + $0x38] sm:$0xff]   ;;  %v745_v16 = vld [vmem:[#allocation8 + $0x38] sm:$0xff]  }
  0x61   :  { %661 = vmatprep.mubr.msk.bf16.mxu0 %vm157_vm0, %v732_v3  ;;  %674 = vmatpush3.bf16.msra.mxu0 %v738_v5  ;;  %v571_v17 = vld [vmem:[#allocation7] ss:$0 sm:$0xff]  ;;  %p863_p1 = por %p862_p0, %p861_p13 }
  0x62   :  { %675 = vmatprep.subr.bf16.mxu0 %v739_v6 }
  0x63   :  { %714 = vmatpush3.bf16.msra.mxu1 %v739_v6  ;;  %p864_p2 = pnand %p863_p1, %p857_p12 }
  0x64   :  { %707 = vmatprep.subr.bf16.mxu1 %v740_v8 }
  0x65   :  { %676 = vmatpush3.bf16.msra.mxu0 %v739_v6 }
  0x66   :  { %677 = vmatprep.subr.bf16.mxu0 %v740_v8 }
  0x67   :  { %715 = vmatpush3.bf16.msra.mxu1 %v740_v8 }
  0x68   :  { %662 = vmatmul.mubr.msk.bf16.gmra.mrb[4].mxu0 %vm157_vm0, %v733_v4  ;;  %708 = vmatprep.subr.bf16.mxu1 %v741_v9 }
  0x69   :  { %665 = vmatprep.mubr.msk.bf16.mxu0 %vm157_vm0, %v734_v7  ;;  %678 = vmatpush3.bf16.msra.mxu0 %v740_v8 }
  0x6a   :  { %679 = vmatprep.subr.bf16.mxu0 %v741_v9 }
  0x6b   :  { %716 = vmatpush3.bf16.msra.mxu1 %v741_v9 }
  0x6c   :  { %709 = vmatprep.subr.bf16.mxu1 %v742_v12 }
  0x6d   :  { %680 = vmatpush3.bf16.msra.mxu0 %v741_v9 }
  0x6e   :  { %681 = vmatprep.subr.bf16.mxu0 %v742_v12 }
  0x6f   :  { %717 = vmatpush3.bf16.msra.mxu1 %v742_v12 }
  0x70   :  { %666 = vmatmul.mubr.msk.bf16.gmra.mrb[8].mxu0 %vm157_vm0, %v735_v10  ;;  %710 = vmatprep.subr.bf16.mxu1 %v743_v13  ;;  %v589_v10 = vld [vmem:[#allocation10] ss:$0 sm:$0xff] }
  0x71   :  { %669 = vmatprep.mubr.msk.bf16.mxu0 %vm157_vm0, %v736_v11  ;;  %682 = vmatpush3.bf16.msra.mxu0 %v742_v12 }
  0x72   :  { %683 = vmatprep.subr.bf16.mxu0 %v743_v13 }
  0x73   :  { %718 = vmatpush3.bf16.msra.mxu1 %v743_v13 }
  0x74   :  { %711 = vmatprep.subr.bf16.mxu1 %v744_v15 }
  0x75   :  { %684 = vmatpush3.bf16.msra.mxu0 %v743_v13 }
  0x76   :  { %685 = vmatprep.subr.bf16.mxu0 %v744_v15 }
  0x77   :  { %719 = vmatpush3.bf16.msra.mxu1 %v744_v15 }
  0x78   :  { %670 = vmatmul.mubr.msk.bf16.gmra.mrb[12].mxu0 %vm157_vm0, %v737_v14  ;;  %712 = vmatprep.subr.bf16.mxu1 %v745_v16 }
  0x79   :  { %686 = vmatpush3.bf16.msra.mxu0 %v744_v15 }
  0x7a   :  { %687 = vmatprep.subr.bf16.mxu0 %v745_v16 }
  0x7b   :  { %720 = vmatpush3.bf16.msra.mxu1 %v745_v16 }
  0x7d   :  { %688 = vmatpush3.bf16.msra.mxu0 %v745_v16 }
 0x133   :  { %v659_v18 = vpop.f32.mrb[0].mxu0 }
 0x134   :  { %v225_v19 = vadd.f32 %v659_v18, %v571_v17  ;;  %v216_v20 = vpop.f32.mrb[1].mxu0 }
 0x135   :  { %v217_v21 = vadd.f32 %v571_v17, %v216_v20  ;;  %v660_v22 = vpop.f32.mrb[2].mxu0 }
 0x136   :  { %v228_v23 = vadd.f32 %v660_v22, %v571_v17  ;;  %v219_v24 = vpop.f32.mrb[3].mxu0  ;;  %v281_v26 = vmax.f32 %v225_v19, 0.0 }
 0x137   :  { %v220_v25 = vadd.f32 %v571_v17, %v219_v24  ;;  %v279_v28 = vmax.f32 %v217_v21, 0.0 }
 0x138   :  { %v282_v27 = vmax.f32 %v228_v23, 0.0 }
 0x139   :  { %v280_v29 = vmax.f32 %v220_v25, 0.0 }
 0x13a   :  { %v296_v30 = vpack.c.bf16 %v282_v27, %v281_v26 }
 0x13b   :  { %v295_v31 = vpack.c.bf16 %v280_v29, %v279_v28  ;;  %v663_v32 = vpop.f32.mrb[4].mxu0 }
 0x13c   :  { %v241_v33 = vadd.f32 %v663_v32, %v571_v17  ;;  %v232_v34 = vpop.f32.mrb[5].mxu0 }
 0x13d   :  { %v233_v35 = vadd.f32 %v571_v17, %v232_v34  ;;  %v664_v36 = vpop.f32.mrb[6].mxu0  ;;  %689 = vmatprep.mubr.bf16.mxu0 %v295_v31 }
 0x13e   :  { %v244_v37 = vadd.f32 %v664_v36, %v571_v17  ;;  %v235_v38 = vpop.f32.mrb[7].mxu0  ;;  %690 = vmatmul.mubr.bf16.vlgmr.msra.gmra.mrb[16].mxu0 %v296_v30  ;;  %v285_v40 = vmax.f32 %v241_v33, 0.0 }
 0x13f   :  { %v236_v39 = vadd.f32 %v571_v17, %v235_v38  ;;  %v283_v42 = vmax.f32 %v233_v35, 0.0 }
 0x140   :  { %v286_v41 = vmax.f32 %v244_v37, 0.0 }
 0x141   :  { %v284_v43 = vmax.f32 %v236_v39, 0.0 }
 0x142   :  { %v298_v44 = vpack.c.bf16 %v286_v41, %v285_v40 }
 0x143   :  { %v667_v45 = vpop.f32.mrb[8].mxu0  ;;  %v297_v46 = vpack.c.bf16 %v284_v43, %v283_v42 }
 0x144   :  { %v257_v47 = vadd.f32 %v667_v45, %v571_v17  ;;  %v248_v48 = vpop.f32.mrb[9].mxu0 }
 0x145   :  { %v249_v49 = vadd.f32 %v571_v17, %v248_v48  ;;  %v668_v50 = vpop.f32.mrb[10].mxu0  ;;  %693 = vmatprep.mubr.bf16.mxu1 %v297_v46 }
 0x146   :  { %v260_v51 = vadd.f32 %v668_v50, %v571_v17  ;;  %v251_v52 = vpop.f32.mrb[11].mxu0  ;;  %694 = vmatmul.mubr.bf16.vlgmr.msra.gmra.mrb[0].mxu1 %v298_v44  ;;  %v289_v54 = vmax.f32 %v257_v47, 0.0 }
 0x147   :  { %v252_v53 = vadd.f32 %v571_v17, %v251_v52  ;;  %v287_v56 = vmax.f32 %v249_v49, 0.0 }
 0x148   :  { %v290_v55 = vmax.f32 %v260_v51, 0.0 }
 0x149   :  { %v288_v57 = vmax.f32 %v252_v53, 0.0 }
 0x14a   :  { %v300_v58 = vpack.c.bf16 %v290_v55, %v289_v54 }
 0x14b   :  { %v299_v59 = vpack.c.bf16 %v288_v57, %v287_v56  ;;  %v671_v60 = vpop.f32.mrb[12].mxu0 }
 0x14c   :  { %v273_v61 = vadd.f32 %v671_v60, %v571_v17  ;;  %v264_v62 = vpop.f32.mrb[13].mxu0 }
 0x14d   :  { %v265_v63 = vadd.f32 %v571_v17, %v264_v62  ;;  %v672_v0 = vpop.f32.mrb[14].mxu0  ;;  %697 = vmatprep.mubr.bf16.mxu1 %v299_v59 }
 0x14e   :  { %v276_v1 = vadd.f32 %v672_v0, %v571_v17  ;;  %v267_v2 = vpop.f32.mrb[15].mxu0  ;;  %698 = vmatmul.mubr.bf16.gmra.mrb[4].mxu1 %v300_v58  ;;  %v293_v4 = vmax.f32 %v273_v61, 0.0 }
 0x14f   :  { %v268_v3 = vadd.f32 %v571_v17, %v267_v2  ;;  %v291_v6 = vmax.f32 %v265_v63, 0.0 }
 0x150   :  { %v294_v5 = vmax.f32 %v276_v1, 0.0 }
 0x151   :  { %v292_v7 = vmax.f32 %v268_v3, 0.0 }
 0x152   :  { %v302_v8 = vpack.c.bf16 %v294_v5, %v293_v4 }
 0x153   :  { %v301_v9 = vpack.c.bf16 %v292_v7, %v291_v6 }
 0x155   :  { %701 = vmatprep.mubr.bf16.mxu1 %v301_v9 }
 0x156   :  { %702 = vmatmul.mubr.bf16.gmra.mrb[8].mxu1 %v302_v8 }
 0x211   :  { %v691_v11 = vpop.f32.mrb[16].mxu0 }
 0x212   :  { %v417_v12 = vadd.f32 %v691_v11, %v589_v10  ;;  %v408_v13 = vpop.f32.mrb[17].mxu0 }
 0x213   :  { %v409_v14 = vadd.f32 %v589_v10, %v408_v13  ;;  %v692_v15 = vpop.f32.mrb[18].mxu0 }
 0x214   :  { %v616_v16 = vpack.c.bf16 %v417_v12, %v417_v12  ;;  %v420_v18 = vadd.f32 %v692_v15, %v589_v10  ;;  %v411_v19 = vpop.f32.mrb[19].mxu0 }
 0x215   :  { %v614_v20 = vpack.c.bf16 %v409_v14, %v409_v14  ;;  %v412_v17 = vadd.f32 %v589_v10, %v411_v19 }
 0x216   :  { %538 = vst.msk [vmem:[#allocation11 + $0x8] sm:$0xf] %vm535_vm1, %v616_v16  ;;  %v617_v21 = vpack.c.bf16 %v420_v18, %v420_v18 }
 0x217   :  { %536 = vst.msk [vmem:[#allocation11] sm:$0xf] %vm535_vm1, %v614_v20  ;;  %v615_v22 = vpack.c.bf16 %v412_v17, %v412_v17 }
 0x218   :  { %539 = vst.msk [vmem:[#allocation11 + $0xc] sm:$0xf] %vm535_vm1, %v617_v21 }
 0x219   :  { %537 = vst.msk [vmem:[#allocation11 + $0x4] sm:$0xf] %vm535_vm1, %v615_v22  ;;  %v695_v23 = vpop.f32.mrb[0].mxu1 }
 0x21a   :  { %v433_v24 = vadd.f32 %v695_v23, %v589_v10  ;;  %v424_v25 = vpop.f32.mrb[1].mxu1 }
 0x21b   :  { %v425_v26 = vadd.f32 %v589_v10, %v424_v25  ;;  %v696_v27 = vpop.f32.mrb[2].mxu1 }
 0x21c   :  { %v620_v28 = vpack.c.bf16 %v433_v24, %v433_v24  ;;  %v436_v29 = vadd.f32 %v696_v27, %v589_v10  ;;  %v427_v30 = vpop.f32.mrb[3].mxu1 }
 0x21d   :  { %v618_v31 = vpack.c.bf16 %v425_v26, %v425_v26  ;;  %v428_v32 = vadd.f32 %v589_v10, %v427_v30 }
 0x21e   :  { %542 = vst.msk [vmem:[#allocation11 + $0x18] sm:$0xf] %vm535_vm1, %v620_v28  ;;  %v621_v33 = vpack.c.bf16 %v436_v29, %v436_v29 }
 0x21f   :  { %540 = vst.msk [vmem:[#allocation11 + $0x10] sm:$0xf] %vm535_vm1, %v618_v31  ;;  %v619_v34 = vpack.c.bf16 %v428_v32, %v428_v32 }
 0x220   :  { %543 = vst.msk [vmem:[#allocation11 + $0x1c] sm:$0xf] %vm535_vm1, %v621_v33 }
 0x221   :  { %541 = vst.msk [vmem:[#allocation11 + $0x14] sm:$0xf] %vm535_vm1, %v619_v34  ;;  %v699_v35 = vpop.f32.mrb[4].mxu1 }
 0x222   :  { %v449_v36 = vadd.f32 %v699_v35, %v589_v10  ;;  %v440_v37 = vpop.f32.mrb[5].mxu1 }
 0x223   :  { %v441_v38 = vadd.f32 %v589_v10, %v440_v37  ;;  %v700_v39 = vpop.f32.mrb[6].mxu1 }
 0x224   :  { %v624_v40 = vpack.c.bf16 %v449_v36, %v449_v36  ;;  %v452_v41 = vadd.f32 %v700_v39, %v589_v10  ;;  %v443_v42 = vpop.f32.mrb[7].mxu1 }
 0x225   :  { %v622_v43 = vpack.c.bf16 %v441_v38, %v441_v38  ;;  %v444_v44 = vadd.f32 %v589_v10, %v443_v42 }
 0x226   :  { %546 = vst.msk [vmem:[#allocation11 + $0x28] sm:$0xf] %vm535_vm1, %v624_v40  ;;  %v625_v45 = vpack.c.bf16 %v452_v41, %v452_v41 }
 0x227   :  { %544 = vst.msk [vmem:[#allocation11 + $0x20] sm:$0xf] %vm535_vm1, %v622_v43  ;;  %v623_v46 = vpack.c.bf16 %v444_v44, %v444_v44 }
 0x228   :  { %547 = vst.msk [vmem:[#allocation11 + $0x2c] sm:$0xf] %vm535_vm1, %v625_v45 }
 0x229   :  { %545 = vst.msk [vmem:[#allocation11 + $0x24] sm:$0xf] %vm535_vm1, %v623_v46  ;;  %v703_v47 = vpop.f32.mrb[8].mxu1 }
 0x22a   :  { %v465_v48 = vadd.f32 %v703_v47, %v589_v10  ;;  %v456_v49 = vpop.f32.mrb[9].mxu1 }
 0x22b   :  { %v457_v50 = vadd.f32 %v589_v10, %v456_v49  ;;  %v704_v51 = vpop.f32.mrb[10].mxu1 }
 0x22c   :  { %v628_v52 = vpack.c.bf16 %v465_v48, %v465_v48  ;;  %v468_v53 = vadd.f32 %v704_v51, %v589_v10  ;;  %v459_v54 = vpop.f32.mrb[11].mxu1 }
 0x22d   :  { %v626_v55 = vpack.c.bf16 %v457_v50, %v457_v50  ;;  %v460_v56 = vadd.f32 %v589_v10, %v459_v54 }
 0x22e   :  { %550 = vst.msk [vmem:[#allocation11 + $0x38] sm:$0xf] %vm535_vm1, %v628_v52  ;;  %v629_v57 = vpack.c.bf16 %v468_v53, %v468_v53 }
 0x22f   :  { %548 = vst.msk [vmem:[#allocation11 + $0x30] sm:$0xf] %vm535_vm1, %v626_v55  ;;  %v627_v58 = vpack.c.bf16 %v460_v56, %v460_v56 }
 0x230   :  { %551 = vst.msk [vmem:[#allocation11 + $0x3c] sm:$0xf] %vm535_vm1, %v629_v57 }
 0x231   :  { %549 = vst.msk [vmem:[#allocation11 + $0x34] sm:$0xf] %vm535_vm1, %v627_v58 }
 0x232   :  { %867 = shalt.err (!%p864_p2)
}
 0x233   :  { %s868_s9 = scalar_lea.hbm %s1044_s5, 1024 }
 0x234   :  { %p869_p3 = scmp.ne.s32.totalorder %s1044_s5, %s868_s9  ;;  %p872_p4 = scmp.lt.u32.totalorder %s868_s9, %s1044_s5 }
 0x236   :  { %p874_p5 = pnand %p872_p4, %p869_p3 }
 0x238   :  { %877 = shalt.err (!%p874_p5)
}
 0x239   :  { %563 = dma.vmem_to_hbm [thread:$0]  %s558_s3, 1024, %s1044_s5, [#allocation4], %s888_s30, %s888_s30, %s889_s6  }
 0x23a   :  { %884 = dma.done.wait [#allocation4], 1024  }
 0x23b   :  { %885 = vsyncadd [#allocation4], 4294966272 }
 0x23c   :  { %567 = vsyncpa [#allocation3], 1 }
 0x23d   :  { %568 = vsyncpa [#allocation6], 1 }
 0x23e   :  { %569 = vsyncpa [#allocation9], 1 }
 0x23f   :  { %570 = vsyncpa [#allocation4], 1 }

</bundles_post_ra>
